<compile_context>
chip_gen: v7x
topology: tpu7x:2x2x1
jax: 0.10.0
libtpu: 0.0.40
codegen_flags: <defaults>
</compile_context>

<pallas_src>
import math

import jax
import jax.numpy as jnp
from jax import lax
from jax.experimental import pallas as pl
from jax.experimental.pallas import tpu as pltpu


_INV_SQRT2 = 1.0 / math.sqrt(2.0)


def _round_up(x, m):
    return ((x + m - 1) // m) * m


def _gelu_exact(x):
    # nn.GELU() default (approximate='none'): 0.5*x*(1+erf(x/sqrt(2))).
    # Python-float constants are weakly typed, so this stays in x's dtype.
    return 0.5 * x * (1.0 + lax.erf(x * _INV_SQRT2))


def _tpu_config():
    """Per-generation tiling / dtype / VMEM choices with safe fallbacks."""
    kind = ""
    try:
        kind = jax.devices()[0].device_kind.lower()
    except Exception:
        pass
    vmem_cap = None
    try:
        vmem_cap = int(pltpu.get_tpu_info().vmem_capacity_bytes)
    except Exception:
        vmem_cap = None

    is_v5e = ("v5 lite" in kind) or ("v5e" in kind) or ("v5lite" in kind)
    is_v6 = "v6" in kind
    is_v7 = ("v7" in kind) or ("tpu7" in kind)

    if vmem_cap is None:
        vmem_cap = (128 << 20) if (is_v5e or is_v6) else (64 << 20)

    if is_v5e:
        tm, gelu_bf16 = 128, False     # MXU-bound; no bf16 VPU/EUP; 1 vst slot
    elif is_v6:
        tm, gelu_bf16 = 512, True      # 128 MiB VMEM; bf16 VALU
    elif is_v7:
        tm, gelu_bf16 = 256, True      # 64 MiB VMEM; 2 TCs; bf16 VALU
    else:
        tm, gelu_bf16 = 256, False     # conservative default
    return {"vmem_cap": vmem_cap, "tm": tm, "gelu_bf16": gelu_bf16}


def _make_kernel(gelu_bf16):
    gelu_dtype = jnp.bfloat16 if gelu_bf16 else jnp.float32

    def kernel(x_ref, w1_ref, b1_ref, w2_ref, b2_ref, o_ref, acc_ref, xb_ref):
        # x_ref : (TM, Dp) in-dtype      w1_ref: (Dp, TH) bf16   b1_ref: (1, TH) f32
        # w2_ref: (TH, Dp) bf16          b2_ref: (1, Dp)  f32    o_ref : (TM, Dp)
        # acc_ref: (TM, Dp) f32 scratch  xb_ref: (TM, Dp) bf16 scratch
        k = pl.program_id(1)

        @pl.when(k == 0)
        def _():
            acc_ref[...] = jnp.zeros_like(acc_ref)
            # cast the row tile to bf16 once per M tile (not once per H chunk)
            xb_ref[...] = x_ref[...].astype(xb_ref.dtype)

        h = jnp.dot(xb_ref[...], w1_ref[...],
                    preferred_element_type=jnp.float32)        # (TM, TH) on MXU
        h = h + b1_ref[...]                                    # bias add in f32
        g = _gelu_exact(h.astype(gelu_dtype))                  # exact erf GELU
        # dropout p=0.0 -> identity
        acc_ref[...] += jnp.dot(g.astype(jnp.bfloat16), w2_ref[...],
                                preferred_element_type=jnp.float32)

        @pl.when(k == pl.num_programs(1) - 1)
        def _():
            o_ref[...] = (acc_ref[...] + b2_ref[...]).astype(o_ref.dtype)

    return kernel


def feedforward(x, w1, b1, w2, b2, *, tm=None, th=512, gelu_bf16=None):
    """x: (B, S, D). w1: (D, H), b1: (1, H), w2: (H, D), b2: (1, D).

    Weights are stored (in_features, out_features), i.e. transposed vs
    PyTorch's nn.Linear, so the kernel computes x @ W + b."""
    B, S, D = x.shape
    H = w1.shape[1]
    assert w1.shape == (D, H) and w2.shape == (H, D)
    assert b1.shape == (1, H) and b2.shape == (1, D)
    M = B * S

    cfg = _tpu_config()
    if tm is None:
        tm = cfg["tm"]
    if gelu_bf16 is None:
        gelu_bf16 = cfg["gelu_bf16"]

    x2d = x.reshape(M, D)

    # Lane-dense feature dims.  Aligned (common) case: no activation pad/cast
    # pass at all.  Unaligned fallback: pad feature dims only.
    Dp = _round_up(D, 128)
    Hp = _round_up(H, 128)
    need_pad = (Dp != D) or (Hp != H)
    if need_pad:
        x2d = jnp.pad(x2d, ((0, 0), (0, Dp - D)))
        w1 = jnp.pad(w1, ((0, Dp - D), (0, Hp - H)))
        b1 = jnp.pad(b1, ((0, 0), (0, Hp - H)))
        w2 = jnp.pad(w2, ((0, Hp - H), (0, Dp - D)))
        b2 = jnp.pad(b2, ((0, 0), (0, Dp - D)))
    w1 = w1.astype(jnp.bfloat16)           # one-time weight cast (small)
    w2 = w2.astype(jnp.bfloat16)
    b1 = b1.astype(jnp.float32)
    b2 = b2.astype(jnp.float32)

    # Row tiling: Pallas handles the partial last M block (OOB rows dropped).
    tm_eff = max(8, min(tm, _round_up(M, 8)))
    num_m = pl.cdiv(M, tm_eff)
    if num_m < 2 and M > 8:
        # make the "parallel" axis shardable across 2 TensorCores (v7x)
        tm_eff = _round_up(pl.cdiv(M, 2), 8)
        num_m = pl.cdiv(M, tm_eff)

    # Hidden-dim reduction tiling (th must divide Hp; Hp % 128 == 0).
    th_eff = max(128, min(_round_up(th, 128), Hp))
    while Hp % th_eff != 0:
        th_eff -= 128
    num_h = Hp // th_eff

    in_bytes = jnp.dtype(x.dtype).itemsize
    vmem_est = (
        2 * tm_eff * Dp * in_bytes           # x tile (double-buffered)
        + 2 * tm_eff * Dp * in_bytes         # output tile (double-buffered)
        + 2 * 2 * Dp * th_eff * 2            # W1 + W2 chunks, bf16, double-buffered
        + 2 * (th_eff + Dp) * 4              # b1 / b2
        + tm_eff * Dp * (4 + 2)              # acc (f32) + xb (bf16) scratch
        + 2 * tm_eff * th_eff * 4            # live (TM, TH) intermediate headroom
    )
    vmem_limit = int(min(max(2 * vmem_est, 16 << 20), (cfg["vmem_cap"] * 3) // 4))

    cost = pl.CostEstimate(
        flops=4 * M * Dp * Hp,               # two matmuls, 2*M*D*H each
        transcendentals=0,                   # erf lowers to a VPU polynomial
        bytes_accessed=(x2d.size * in_bytes + w1.size * 2 + w2.size * 2
                        + b1.size * 4 + b2.size * 4 + M * Dp * in_bytes),
    )

    out = pl.pallas_call(
        _make_kernel(gelu_bf16),
        out_shape=jax.ShapeDtypeStruct((M, Dp), x.dtype),
        grid_spec=pltpu.PrefetchScalarGridSpec(
            num_scalar_prefetch=0,
            grid=(num_m, num_h),
            in_specs=[
                pl.BlockSpec((tm_eff, Dp), lambda i, k: (i, 0)),   # x (resident over k)
                pl.BlockSpec((Dp, th_eff), lambda i, k: (0, k)),   # W1 column chunk
                pl.BlockSpec((1, th_eff), lambda i, k: (0, k)),    # b1 chunk
                pl.BlockSpec((th_eff, Dp), lambda i, k: (k, 0)),   # W2 row chunk
                pl.BlockSpec((1, Dp), lambda i, k: (0, 0)),        # b2 (resident)
            ],
            out_specs=pl.BlockSpec((tm_eff, Dp), lambda i, k: (i, 0)),
            scratch_shapes=[pltpu.VMEM((tm_eff, Dp), jnp.float32),
                            pltpu.VMEM((tm_eff, Dp), jnp.bfloat16)],
        ),
        compiler_params=pltpu.CompilerParams(
            dimension_semantics=("parallel", "arbitrary"),
            vmem_limit_bytes=vmem_limit,
        ),
        cost_estimate=cost,
    )(x2d, w1, b1, w2, b2)

    if need_pad:
        out = out[:, :D]
    return out.reshape(B, S, D)


def init_params(key, dim, mult=4):
    """Deterministic init mimicking nn.Linear's uniform(-1/sqrt(fan_in), ...).

    Weights returned already transposed to (in, out)."""
    hidden = dim * mult
    k1, k2, k3, k4 = jax.random.split(key, 4)
    bound1 = 1.0 / math.sqrt(dim)
    bound2 = 1.0 / math.sqrt(hidden)
    w1 = jax.random.uniform(k1, (dim, hidden), jnp.float32, -bound1, bound1)
    b1 = jax.random.uniform(k2, (1, hidden), jnp.float32, -bound1, bound1)
    w2 = jax.random.uniform(k3, (hidden, dim), jnp.float32, -bound2, bound2)
    b2 = jax.random.uniform(k4, (1, dim), jnp.float32, -bound2, bound2)
    return w1, b1, w2, b2


def _reference(x, w1, b1, w2, b2):
    B, S, D = x.shape
    h = _gelu_exact(x.reshape(-1, D) @ w1 + b1)
    return (h @ w2 + b2).reshape(B, S, D)


if __name__ == "__main__":
    key = jax.random.PRNGKey(0)

    # Aligned fast path: D and H multiples of 128 -> no wrapper pad/cast of x.
    B, S, D, MULT = 2, 8, 128, 4
    kx, kp, key = jax.random.split(key, 3)
    x = jax.random.normal(kx, (B, S, D), jnp.float32)
    w1, b1, w2, b2 = init_params(kp, D, MULT)
    y = jax.block_until_ready(feedforward(x, w1, b1, w2, b2))
    y_ref = _reference(x, w1, b1, w2, b2)
    assert jnp.allclose(y, y_ref, atol=2.5e-2, rtol=2.5e-2), "aligned-path mismatch"

    # Unaligned fallback path (D=32 -> feature dims padded to 128).
    B2, S2, D2, MULT2 = 2, 8, 32, 4
    kx2, kp2 = jax.random.split(key)
    x2 = jax.random.normal(kx2, (B2, S2, D2), jnp.float32)
    p2 = init_params(kp2, D2, MULT2)
    y2 = jax.block_until_ready(feedforward(x2, *p2))
    y2_ref = _reference(x2, *p2)
    assert jnp.allclose(y2, y2_ref, atol=2.5e-2, rtol=2.5e-2), "padded-path mismatch"

    print("KERNEL_OK")
</pallas_src>

<mosaic_0001>
module attributes {stable_mosaic.version = 11 : i64} {
  func.func @kernel(%arg0: i32, %arg1: i32, %arg2: memref<8x128xf32, #tpu.memory_space<vmem>>, %arg3: memref<128x512xbf16, #tpu.memory_space<vmem>>, %arg4: memref<1x512xf32, #tpu.memory_space<vmem>>, %arg5: memref<512x128xbf16, #tpu.memory_space<vmem>>, %arg6: memref<1x128xf32, #tpu.memory_space<vmem>>, %arg7: memref<8x128xf32, #tpu.memory_space<vmem>>, %arg8: memref<8x128xf32, #tpu.memory_space<vmem>>, %arg9: memref<8x128xbf16, #tpu.memory_space<vmem>>) attributes {dimension_semantics = [#tpu.dimension_semantics<parallel>, #tpu.dimension_semantics<arbitrary>], iteration_bounds = array<i64: 2, 1>, scalar_prefetch = 0 : i64, scratch_operands = 2 : i64, tpu.core_type = #tpu.core_type<tc>, window_params = [{transform_indices = @transform_0, window_bounds = array<i64: 8, 128>}, {transform_indices = @transform_1, window_bounds = array<i64: 128, 512>}, {transform_indices = @transform_2, window_bounds = array<i64: 1, 512>}, {transform_indices = @transform_3, window_bounds = array<i64: 512, 128>}, {pipeline_mode = #tpu.pipeline_mode<synchronous>, transform_indices = @transform_4, window_bounds = array<i64: 1, 128>}, {transform_indices = @transform_5, window_bounds = array<i64: 8, 128>}]} {
    %c0_i32 = arith.constant 0 : i32
    %0 = arith.cmpi eq, %arg1, %c0_i32 : i32
    %1 = arith.extui %0 : i1 to i32
    %c0_i32_0 = arith.constant 0 : i32
    %2 = arith.cmpi ne, %1, %c0_i32_0 : i32
    scf.if %2 {
      %cst_18 = arith.constant 0.000000e+00 : f32
      %26 = vector.broadcast %cst_18 : f32 to vector<8x128xf32>
      %c0_19 = arith.constant 0 : index
      %c0_20 = arith.constant 0 : index
      %27 = vector.load %arg8[%c0_19, %c0_20] : memref<8x128xf32, #tpu.memory_space<vmem>>, vector<8x128xf32>
      tpu.vector_store %arg8[%c0_19, %c0_20], %26 {strides = array<i32>} : memref<8x128xf32, #tpu.memory_space<vmem>>, vector<8x128xf32>,
      %c0_21 = arith.constant 0 : index
      %c0_22 = arith.constant 0 : index
      %28 = vector.load %arg2[%c0_21, %c0_22] : memref<8x128xf32, #tpu.memory_space<vmem>>, vector<8x128xf32>
      %29 = arith.truncf %28 : vector<8x128xf32> to vector<8x128xbf16>
      %c0_23 = arith.constant 0 : index
      %c0_24 = arith.constant 0 : index
      %30 = vector.load %arg9[%c0_23, %c0_24] : memref<8x128xbf16, #tpu.memory_space<vmem>>, vector<8x128xbf16>
      tpu.vector_store %arg9[%c0_23, %c0_24], %29 {strides = array<i32>} : memref<8x128xbf16, #tpu.memory_space<vmem>>, vector<8x128xbf16>,
    } else {
    }
    %c0 = arith.constant 0 : index
    %c0_1 = arith.constant 0 : index
    %3 = vector.load %arg9[%c0, %c0_1] : memref<8x128xbf16, #tpu.memory_space<vmem>>, vector<8x128xbf16>
    %c0_2 = arith.constant 0 : index
    %c0_3 = arith.constant 0 : index
    %4 = vector.load %arg3[%c0_2, %c0_3] : memref<128x512xbf16, #tpu.memory_space<vmem>>, vector<128x512xbf16>
    %cst = arith.constant dense<0.000000e+00> : vector<8x512xf32>
    %5 = tpu.matmul %3, %4, %cst {dimension_numbers = #tpu.dot_dimension_numbers<[1], [0], [0], [1], [0, 0, 1, 1], [], []>} : vector<8x128xbf16>, vector<128x512xbf16>, vector<8x512xf32> -> vector<8x512xf32>
    %c0_4 = arith.constant 0 : index
    %c0_5 = arith.constant 0 : index
    %6 = vector.load %arg4[%c0_4, %c0_5] : memref<1x512xf32, #tpu.memory_space<vmem>>, vector<1x512xf32>
    %7 = vector.broadcast %6 : vector<1x512xf32> to vector<8x512xf32>
    %8 = arith.addf %5, %7 : vector<8x512xf32>
    %cst_6 = arith.constant 5.000000e-01 : f32
    %9 = vector.broadcast %cst_6 : f32 to vector<8x512xf32>
    %10 = arith.mulf %9, %8 : vector<8x512xf32>
    %cst_7 = arith.constant 0.707106769 : f32
    %11 = vector.broadcast %cst_7 : f32 to vector<8x512xf32>
    %12 = arith.mulf %8, %11 : vector<8x512xf32>
    %13 = math.erf %12 : vector<8x512xf32>
    %cst_8 = arith.constant 1.000000e+00 : f32
    %14 = vector.broadcast %cst_8 : f32 to vector<8x512xf32>
    %15 = arith.addf %14, %13 : vector<8x512xf32>
    %16 = arith.mulf %10, %15 : vector<8x512xf32>
    %c0_9 = arith.constant 0 : index
    %c0_10 = arith.constant 0 : index
    %17 = vector.load %arg8[%c0_9, %c0_10] : memref<8x128xf32, #tpu.memory_space<vmem>>, vector<8x128xf32>
    %18 = arith.truncf %16 : vector<8x512xf32> to vector<8x512xbf16>
    %c0_11 = arith.constant 0 : index
    %c0_12 = arith.constant 0 : index
    %19 = vector.load %arg5[%c0_11, %c0_12] : memref<512x128xbf16, #tpu.memory_space<vmem>>, vector<512x128xbf16>
    %cst_13 = arith.constant dense<0.000000e+00> : vector<8x128xf32>
    %20 = tpu.matmul %18, %19, %cst_13 {dimension_numbers = #tpu.dot_dimension_numbers<[1], [0], [0], [1], [0, 0, 1, 1], [], []>} : vector<8x512xbf16>, vector<512x128xbf16>, vector<8x128xf32> -> vector<8x128xf32>
    %21 = arith.addf %17, %20 : vector<8x128xf32>
    %c0_14 = arith.constant 0 : index
    %c0_15 = arith.constant 0 : index
    %22 = vector.load %arg8[%c0_14, %c0_15] : memref<8x128xf32, #tpu.memory_space<vmem>>, vector<8x128xf32>
    tpu.vector_store %arg8[%c0_14, %c0_15], %21 {strides = array<i32>} : memref<8x128xf32, #tpu.memory_space<vmem>>, vector<8x128xf32>,
    %c0_i32_16 = arith.constant 0 : i32
    %23 = arith.cmpi eq, %arg1, %c0_i32_16 : i32
    %24 = arith.extui %23 : i1 to i32
    %c0_i32_17 = arith.constant 0 : i32
    %25 = arith.cmpi ne, %24, %c0_i32_17 : i32
    scf.if %25 {
      %c0_18 = arith.constant 0 : index
      %c0_19 = arith.constant 0 : index
      %26 = vector.load %arg8[%c0_18, %c0_19] : memref<8x128xf32, #tpu.memory_space<vmem>>, vector<8x128xf32>
      %c0_20 = arith.constant 0 : index
      %c0_21 = arith.constant 0 : index
      %27 = vector.load %arg6[%c0_20, %c0_21] : memref<1x128xf32, #tpu.memory_space<vmem>>, vector<1x128xf32>
      %28 = vector.broadcast %27 : vector<1x128xf32> to vector<8x128xf32>
      %29 = arith.addf %26, %28 : vector<8x128xf32>
      %c0_22 = arith.constant 0 : index
      %c0_23 = arith.constant 0 : index
      %30 = vector.load %arg7[%c0_22, %c0_23] : memref<8x128xf32, #tpu.memory_space<vmem>>, vector<8x128xf32>
      tpu.vector_store %arg7[%c0_22, %c0_23], %29 {strides = array<i32>} : memref<8x128xf32, #tpu.memory_space<vmem>>, vector<8x128xf32>,
    } else {
    }
    return
  }
  func.func @transform_0(%arg0: i32, %arg1: i32) -> (i32, i32) {
    %c0_i32 = arith.constant 0 : i32
    %c0_i32_0 = arith.constant 0 : i32
    return %arg0, %c0_i32 : i32, i32
  }
  func.func @transform_1(%arg0: i32, %arg1: i32) -> (i32, i32) {
    %c0_i32 = arith.constant 0 : i32
    %c0_i32_0 = arith.constant 0 : i32
    return %c0_i32, %arg1 : i32, i32
  }
  func.func @transform_2(%arg0: i32, %arg1: i32) -> (i32, i32) {
    %c0_i32 = arith.constant 0 : i32
    %c0_i32_0 = arith.constant 0 : i32
    return %c0_i32, %arg1 : i32, i32
  }
  func.func @transform_3(%arg0: i32, %arg1: i32) -> (i32, i32) {
    %c0_i32 = arith.constant 0 : i32
    %c0_i32_0 = arith.constant 0 : i32
    return %arg1, %c0_i32 : i32, i32
  }
  func.func @transform_4(%arg0: i32, %arg1: i32) -> (i32, i32) {
    %c0_i32 = arith.constant 0 : i32
    %c0_i32_0 = arith.constant 0 : i32
    %c0_i32_1 = arith.constant 0 : i32
    return %c0_i32, %c0_i32_0 : i32, i32
  }
  func.func @transform_5(%arg0: i32, %arg1: i32) -> (i32, i32) {
    %c0_i32 = arith.constant 0 : i32
    %c0_i32_0 = arith.constant 0 : i32
    return %arg0, %c0_i32 : i32, i32
  }
}

</mosaic_0001>

<bundles_post_ra>
// kernel: tpu_custom_call.1
= control target key start
LH: loop header
LB: loop body
LE: loop exit
PB: predicated region body
PF: predicated region fallthrough
CT: control target
= control target key end

     0   :  { %10 = vsyncpa [#allocation5], 0  ;;  %s1906_s0 = inlined_call_operand.hbm [shape: f32[16,128], index: 0, kind: input, shape index: {}]   ;;  %s1907_s1 = inlined_call_operand.hbm [shape: bf16[128,512], index: 1, kind: input, shape index: {}]   ;;  %s1908_s2 = inlined_call_operand.vmem [shape: f32[1,512], index: 2, kind: input, shape index: {}]   ;;  %s1909_s3 = inlined_call_operand.hbm [shape: bf16[512,128], index: 3, kind: input, shape index: {}]   ;;  %s1910_s4 = inlined_call_operand.vmem [shape: f32[1,128], index: 4, kind: input, shape index: {}]   ;;  %s1911_s5 = inlined_call_operand.hbm [shape: f32[16,128], index: 5, kind: output, shape index: {}]  }
   0x1   :  { %12 = vsyncpa [#allocation5 + $0x1], 0 }
   0x2   :  { %13 = vsyncpa [#allocation8], 0 }
   0x3   :  { %14 = vsyncpa [#allocation6], 0 }
   0x4   :  { %16 = vsyncpa [#allocation6 + $0x1], 0  ;;  %s1643_s18 = smov 0   ;;  %s1645_s19 = smov 0  }
   0x5   :  { %s1647_s20 = smov 0   ;;  %s1649_s21 = smov 0  }
   0x6   :  { %s1651_s22 = smov 0   ;;  %s1653_s23 = smov 0  }
   0x7 LB: > { %s1127_s24 = sadd.s32 4294967295, %s1602_s23   ;;  %s1128_s25 = sadd.s32 4294967294, %s1602_s23   ;;  %s1602_s23 = sphi %s1653_s23, %s22_s23   ;;  %s1598_s22 = sphi %s1651_s22, %s1933_s22   ;;  %s1594_s21 = sphi %s1649_s21, %s1932_s21   ;;  %s1590_s20 = sphi %s1647_s20, %s1931_s20   ;;  %s1586_s19 = sphi %s1645_s19, %s1930_s19   ;;  %s1582_s18 = sphi %s1643_s18, %s1929_s18  }
   0x8   : > { %p54_p0 = scmp.ne.s32.totalorder %s1586_s19, %s1582_s18  ;;  %p1677_p1 = scmp.eq.s32.totalorder %s1127_s24, 0 }
   0x9   : > { %p1681_p2 = scmp.eq.s32.totalorder %s1127_s24, 1  ;;  %p183_p3 = scmp.eq.s32.totalorder %s1128_s25, 1 }
   0xa   : > { %s1916_s26 = scalar_select %p1677_p1, 1, 0 }
   0xb   : > { %p1687_p4 = por %p1677_p1, %p54_p0  ;;  %p1129_p5 = scmp.ge.s32.totalorder %s1602_s23, 1 }
   0xc   : > { %p1692_p6 = por %p183_p3, %p54_p0  ;;  %p190_p7 = scmp.lt.s32.totalorder %s1602_s23, 3 }
   0xd   : > { %s1918_s28 = scalar_select %p1687_p4, 1, 0 }
   0xe   : > { %s1919_s29 = scalar_select %p1692_p6, 1, 0 }
   0xf   : > { %p1697_p8 = pnand %p1129_p5, %p190_p7  ;;  %s1604_s6 = smov [#allocation7]  }
  0x10   : > { %s205_s7 = sshll.u32 %s1604_s6, 4  ;;  %s1605_s9 = smov [#allocation9]   ;;  %s1701_s7 = int_to_ptr.vmem [resolvable:$true] %s205_s7 }
  0x11   : > { %p1266_p9 = pneg %p1697_p8  ;;  %s229_s10 = sshll.u32 %s1605_s9, 4  ;;  %s1712_s10 = int_to_ptr.vmem [resolvable:$true] %s229_s10 }
  0x12   : > { %s1430_s13 = scalar_lea.hbm %s1907_s1, 4096 }
  0x13   : > { %p1708_p11 = pnand %p1266_p9, %p1677_p1  ;;  %p1431_p12 = scmp.ne.s32.totalorder %s1907_s1, %s1430_s13 }
  0x14   : > { %p1437_p5 = scmp.lt.u32.totalorder %s1430_s13, %s1907_s1 }
  0x15   : > { %p1432_p13 = pneg %p1708_p11 }
  0x17   : > { %p1433_p0 = pnand %p1432_p13, %p1431_p12 }
  0x19   : > { %p1434_p3 = pneg %p1433_p0 }
  0x1b   : > { %p1439_p7 = pnand %p1437_p5, %p1434_p3 }
  0x1d   : > { %1442 = shalt.err (!%p1439_p7)
}
  0x1e   : > { %s1443_s24 = scalar_lea.vmem %s1701_s7, 4096  ;;  %p1451_p1 = scmp.lt.s32.totalorder %s1701_s7, %s1701_s7 }
  0x1f   : > { %p1444_p9 = scmp.ne.s32.totalorder %s1701_s7, %s1443_s24  ;;  %p1452_p12 = scmp.lt.s32.totalorder %s1443_s24, %s1443_s24 }
  0x21   : > { %p1446_p10 = pnand %p1444_p9, %p1432_p13  ;;  %p1453_p0 = por %p1452_p12, %p1451_p1 }
  0x23   : > { %p1447_p6 = pneg %p1446_p10 }
  0x25   : > { %p1454_p4 = pnand %p1453_p0, %p1447_p6 }
  0x27   : > { %1457 = shalt.err (!%p1454_p4)
}
  0x28   : > { %s1606_s25 = smov 256   ;;  %s1607_s6 = smov 16  }
  0x29   : > { %1269 = dma.hbm_to_vmem [thread:$0]  (!%p1708_p11), %s1907_s1, 4096, %s1701_s7, [#allocation8], %s1606_s25, %s1606_s25, %s1607_s6  }
  0x2a   : > { %s1458_s14 = scalar_lea.hbm %s1909_s3, 4096 }
  0x2b   : > { %p1459_p1 = scmp.ne.s32.totalorder %s1909_s3, %s1458_s14  ;;  %p1465_p10 = scmp.lt.u32.totalorder %s1458_s14, %s1909_s3 }
  0x2d   : > { %p1461_p4 = pnand %p1459_p1, %p1432_p13 }
  0x2f   : > { %p1462_p6 = pneg %p1461_p4 }
  0x31   : > { %p1467_p3 = pnand %p1465_p10, %p1462_p6 }
  0x33   : > { %1470 = shalt.err (!%p1467_p3)
}
  0x34   : > { %s1471_s7 = scalar_lea.vmem %s1712_s10, 4096  ;;  %p1479_p12 = scmp.lt.s32.totalorder %s1712_s10, %s1712_s10 }
  0x35   : > { %p1472_p5 = scmp.ne.s32.totalorder %s1712_s10, %s1471_s7  ;;  %p1480_p0 = scmp.lt.s32.totalorder %s1471_s7, %s1471_s7 }
  0x37   : > { %p1474_p7 = pnand %p1472_p5, %p1432_p13  ;;  %p1481_p1 = por %p1480_p0, %p1479_p12 }
  0x39   : > { %p1475_p9 = pneg %p1474_p7 }
  0x3b   : > { %p1482_p4 = pnand %p1481_p1, %p1475_p9 }
  0x3d   : > { %1485 = shalt.err (!%p1482_p4)
}
  0x3e   : > { %s1608_s25 = smov 64   ;;  %s1609_s6 = smov 4  }
  0x3f   : > { %1272 = dma.hbm_to_vmem [thread:$0]  (!%p1708_p11), %s1909_s3, 4096, %s1712_s10, [#allocation8], %s1608_s25, %s1608_s25, %s1609_s6  }
  0x40   : > { %s34_s12 = sadd.s32 1, %s1598_s22  ;;  %s41_s13 = sadd.s32 1, %s1590_s20 }
  0x41   : > { %p36_p13 = scmp.ge.s32.totalorder %s34_s12, 2  ;;  %p48_p6 = scmp.ne.s32.totalorder %s1590_s20, %s1586_s19 }
  0x42   : > { %p49_p10 = scmp.eq.s32.totalorder %s1602_s23, 0  ;;  %p1283_p3 = scmp.lt.s32.totalorder %s1602_s23, 2 }
  0x43   : > { %s1935_s12 = smov (%p36_p13, %s34_s12), 0  ;;  %p1776_p7 = por %p1681_p2, %p48_p6 }
  0x44   : > { %p50_p5 = por %p49_p10, %p48_p6  ;;  %s38_s8 = ssub.s32 %s1598_s22, %s1935_s12 }
  0x45   : > { %s1922_s14 = scalar_select %p1776_p7, 1, 0 }
  0x46   : > { %s246_s15 = sand.u32 1, %s1590_s20   ;;  %p39_p9 = scmp.eq.s32.totalorder %s38_s8, 0 }
  0x47   : > { %s1134_s10 = sshll.u32 %s246_s15, 3  ;;  %s1135_s16 = sshll.u32 %s1598_s22, 7 }
  0x48   : > { %s1785_s17 = scalar_select %p39_p9, %s1590_s20, %s41_s13  }
  0x49   : > { %s1790_s25 = scalar_lea.hbm %s1906_s0, %s1135_s16  ;;  %s250_s27 = scalar_lea.vmem [#allocation4], %s1134_s10 }
  0x4a   : > { %s257_s6 = sshll.u32 %s250_s27, 4  ;;  %p1794_p2 = pnand %p1283_p3, %p50_p5  ;;  %s1798_s6 = int_to_ptr.vmem [resolvable:$true] %s257_s6 }
  0x4b   : > { %s247_s11 = scalar_lea.sflag [#allocation5], %s246_s15  ;;  %s1486_s13 = scalar_lea.hbm %s1790_s25, 128 }
  0x4c   : > { %p1487_p11 = scmp.ne.s32.totalorder %s1790_s25, %s1486_s13  ;;  %p1488_p12 = pneg %p1794_p2 }
  0x4d   : > { %s1491_s16 = scalar_lea.hbm %s1906_s0, 256  ;;  %p1492_p4 = scmp.lt.u32.totalorder %s1790_s25, %s1906_s0 }
  0x4e   : > { %p1489_p0 = pnand %p1488_p12, %p1487_p11  ;;  %p1493_p13 = scmp.lt.u32.totalorder %s1491_s16, %s1486_s13 }
  0x4f   : > { %p1495_p10 = scmp.lt.u32.totalorder %s1486_s13, %s1790_s25 }
  0x50   : > { %p1490_p1 = pneg %p1489_p0  ;;  %p1494_p6 = por %p1493_p13, %p1492_p4 }
  0x52   : > { %p1496_p3 = por %p1495_p10, %p1494_p6 }
  0x54   : > { %p1497_p5 = pnand %p1496_p3, %p1490_p1 }
  0x56   : > { %1500 = shalt.err (!%p1497_p5)
}
  0x57   : > { %s1501_s15 = scalar_lea.vmem %s1798_s6, 128  ;;  %s1610_s27 = smov [#allocation4]  }
  0x58   : > { %p1502_p9 = scmp.ne.s32.totalorder %s1798_s6, %s1501_s15  ;;  %s1506_s8 = sshll.u32 %s1610_s27, 4  ;;  %s1507_s8 = int_to_ptr.vmem [resolvable:$false] %s1506_s8 }
  0x59   : > { %s1508_s10 = scalar_lea.vmem %s1507_s8, 256  ;;  %p1509_p7 = scmp.lt.s32.totalorder %s1798_s6, %s1507_s8 }
  0x5a   : > { %p1504_p11 = pnand %p1502_p9, %p1488_p12  ;;  %p1510_p4 = scmp.lt.s32.totalorder %s1508_s10, %s1501_s15 }
  0x5c   : > { %p1505_p0 = pneg %p1504_p11  ;;  %p1511_p13 = por %p1510_p4, %p1509_p7 }
  0x5e   : > { %p1512_p6 = pnand %p1511_p13, %p1505_p0 }
  0x60   : > { %1515 = shalt.err (!%p1512_p6)
}
  0x61   : > { %1276 = dma.hbm_to_vmem [thread:$0]  (!%p1794_p2), %s1790_s25, 128, %s1798_s6, %s247_s11  }
  0x62   : > { %266 = sbr.rel (%p1697_p8) target bundleno = 613 (0x265), region = 40  ;;  %s1828_s13 = sand.u32 (!%p1697_p8), 1, %s1586_s19  }
  0x63   : > { %s1137_s16 = sshll.u32 (!%p1697_p8), %s1828_s13, 3  ;;  %s269_s24 = scalar_lea.sflag (!%p1697_p8), [#allocation5], %s1828_s13 }
  0x64   : > { %s1834_s7 = scalar_lea.vmem (!%p1697_p8), [#allocation4], %s1137_s16  ;;  %p1924_p7 = scmp.ne.s32.totalorder (!%p1697_p8), %s1918_s28, 0 }
  0x69   : > { %1569 = dma.done.wait (%p1924_p7), %s269_s24, 128  }
  0x6a   : > { %1571 = vsyncadd (%p1924_p7), %s269_s24, 4294967168  ;;  %p1925_p2 = scmp.ne.s32.totalorder %s1916_s26, 0 }
  0x6c   : > { %1573 = dma.done.wait (%p1925_p2), [#allocation8], 8192  }
  0x6d   : > { %1575 = vsyncadd (%p1925_p2), [#allocation8], 4294959104  ;;  %v1611_v0 = vmov 0   ;;  %v1342_v1 = vld [vmem:[#allocation7 + $0x4] ss:$16 sps:$4 sm:$0xff]   ;;  %v1394_v40 = vld [vmem:[#allocation9 + $0x48] sm:$0xff]  }
  0x6e   : > { %574 = vmatprep.mubr.bf16.mxu0 %v1611_v0  ;;  %615 = vmatprep.mubr.bf16.mxu1 %v1611_v0  ;;  %v1344_v2 = vld [vmem:[#allocation7 + $0xc] ss:$16 sps:$4 sm:$0xff]   ;;  %v1346_v3 = vld [vmem:[#allocation7] ss:$16 sps:$4 sm:$0xff]   ;;  %v1347_v4 = vld [vmem:[#allocation7 + $0x8] ss:$16 sps:$4 sm:$0xff]  }
  0x6f   : > { %542 = vmatprep.subr.bf16.mxu0 %v1342_v1  ;;  %583 = vmatprep.subr.bf16.mxu1 %v1344_v2  ;;  %v1348_v5 = vld [vmem:[#allocation7 + $0x24] ss:$16 sps:$4 sm:$0xff]   ;;  %v1350_v6 = vld [vmem:[#allocation7 + $0x2c] ss:$16 sps:$4 sm:$0xff]   ;;  %v1352_v7 = vld [vmem:[#allocation7 + $0x20] ss:$16 sps:$4 sm:$0xff]  }
  0x70   : > { %543 = vmatpush1.bf16.msra.mxu0 %v1346_v3  ;;  %584 = vmatpush1.bf16.msra.mxu1 %v1347_v4  ;;  %v1353_v8 = vld [vmem:[#allocation7 + $0x28] ss:$16 sps:$4 sm:$0xff]   ;;  %v1354_v9 = vld [vmem:[#allocation7 + $0x44] ss:$16 sps:$4 sm:$0xff]   ;;  %v1356_v10 = vld [vmem:[#allocation7 + $0x4c] ss:$16 sps:$4 sm:$0xff]   ;;  %v362_v4 = vlaneseq }
  0x71   : > { %544 = vmatprep.subr.bf16.mxu0 %v1348_v5  ;;  %585 = vmatprep.subr.bf16.mxu1 %v1350_v6  ;;  %v1358_v11 = vld [vmem:[#allocation7 + $0x40] ss:$16 sps:$4 sm:$0xff]   ;;  %v1359_v12 = vld [vmem:[#allocation7 + $0x48] ss:$16 sps:$4 sm:$0xff]   ;;  %v1360_v13 = vld [vmem:[#allocation7 + $0x64] ss:$16 sps:$4 sm:$0xff]  }
  0x72   : > { %v1362_v14 = vld [vmem:[#allocation7 + $0x6c] ss:$16 sps:$4 sm:$0xff]   ;;  %v1364_v15 = vld [vmem:[#allocation7 + $0x60] ss:$16 sps:$4 sm:$0xff]   ;;  %v1365_v16 = vld [vmem:[#allocation7 + $0x68] ss:$16 sps:$4 sm:$0xff]  }
  0x73   : > { %v1366_v17 = vld [vmem:[#allocation7 + $0x84] ss:$16 sps:$4 sm:$0xff]   ;;  %v1368_v18 = vld [vmem:[#allocation7 + $0x8c] ss:$16 sps:$4 sm:$0xff]   ;;  %v1370_v19 = vld [vmem:[#allocation7 + $0x80] ss:$16 sps:$4 sm:$0xff]  }
  0x74   : > { %545 = vmatpush1.bf16.msra.mxu0 %v1352_v7  ;;  %586 = vmatpush1.bf16.msra.mxu1 %v1353_v8  ;;  %v1371_v20 = vld [vmem:[#allocation7 + $0x88] ss:$16 sps:$4 sm:$0xff]   ;;  %v1372_v21 = vld [vmem:[#allocation7 + $0xa4] ss:$16 sps:$4 sm:$0xff]   ;;  %v1374_v22 = vld [vmem:[#allocation7 + $0xac] ss:$16 sps:$4 sm:$0xff]  }
  0x75   : > { %546 = vmatprep.subr.bf16.mxu0 %v1354_v9  ;;  %587 = vmatprep.subr.bf16.mxu1 %v1356_v10  ;;  %v1376_v23 = vld [vmem:[#allocation7 + $0xa0] ss:$16 sps:$4 sm:$0xff]   ;;  %v1377_v24 = vld [vmem:[#allocation7 + $0xa8] ss:$16 sps:$4 sm:$0xff]   ;;  %v1378_v25 = vld [vmem:[#allocation7 + $0xc4] ss:$16 sps:$4 sm:$0xff]  }
  0x76   : > { %v1380_v26 = vld [vmem:[#allocation7 + $0xcc] ss:$16 sps:$4 sm:$0xff]   ;;  %v1382_v28 = vld [vmem:[#allocation7 + $0xc0] ss:$16 sps:$4 sm:$0xff]   ;;  %v1383_v30 = vld [vmem:[#allocation7 + $0xc8] ss:$16 sps:$4 sm:$0xff]  }
  0x77   : > { %v324_v27 = vld [vmem:[%s1834_s7] sm:$0xff]  ;;  %v1390_v35 = vld [vmem:[#allocation9 + $0x40] sm:$0xff]   ;;  %v1395_v41 = vld [vmem:[#allocation9 + $0xc8] sm:$0xff]   ;;  %v363_v5 = vshrl.u32 %v362_v4, 7  ;;  %s1207_s6 = sshll.u32 %s1594_s21, 7  ;;  %s310_s9 = scalar_lea.vmem [#allocation10], %s1137_s16 }
  0x78   : > { %547 = vmatpush1.bf16.msra.mxu0 %v1358_v11  ;;  %588 = vmatpush1.bf16.msra.mxu1 %v1359_v12  ;;  %v325_v29 = vpack.c.bf16 %v324_v27, %v324_v27  ;;  %v1384_v31 = vld [vmem:[#allocation7 + $0xe4] ss:$16 sps:$4 sm:$0xff]   ;;  %v1386_v32 = vld [vmem:[#allocation7 + $0xec] ss:$16 sps:$4 sm:$0xff]   ;;  %v1388_v33 = vld [vmem:[#allocation7 + $0xe0] ss:$16 sps:$4 sm:$0xff]   ;;  %s1857_s8 = scalar_lea.hbm %s1911_s5, %s1207_s6 }
  0x79   : > { %548 = vmatprep.subr.bf16.mxu0 %v1360_v13  ;;  %589 = vmatprep.subr.bf16.mxu1 %v1362_v14  ;;  %v1389_v34 = vld [vmem:[#allocation7 + $0xe8] ss:$16 sps:$4 sm:$0xff]   ;;  %v1391_v36 = vld [vmem:[#allocation9 + $0xc0] sm:$0xff]   ;;  %v1398_v44 = vld [vmem:[#allocation9 + $0x50] sm:$0xff]   ;;  %v364_v6 = vsub.s32 0, %v363_v5  ;;  %v372_v7 = vsub.s32 2, %v363_v5 }
  0x7a   : > { %326 = vst [vmem:[#allocation3] sm:$0xf] %v325_v29  ;;  %v1392_v37 = vld [vmem:[#allocation9] sm:$0xff]   ;;  %v1396_v42 = vld [vmem:[#allocation9 + $0x8] sm:$0xff]   ;;  %v1399_v45 = vld [vmem:[#allocation9 + $0xd0] sm:$0xff]   ;;  %v368_v9 = vsub.s32 1, %v363_v5 }
  0x7b   : > { %v1393_v38 = vld [vmem:[#allocation9 + $0x80] sm:$0xff]   ;;  %v1397_v43 = vld [vmem:[#allocation9 + $0x88] sm:$0xff]   ;;  %v1400_v46 = vld [vmem:[#allocation9 + $0x10] sm:$0xff]   ;;  %v376_v10 = vsub.s32 3, %v363_v5  ;;  %s1014_s11 = sshll.u32 %s310_s9, 4  ;;  %s1001_s10 = scalar_lea.sflag [#allocation6], %s1828_s13  ;;  %s1859_s11 = int_to_ptr.vmem [resolvable:$true] %s1014_s11 }
  0x7c   : > { %549 = vmatpush1.bf16.msra.mxu0 %v1364_v15  ;;  %590 = vmatpush1.bf16.msra.mxu1 %v1365_v16  ;;  %v1401_v47 = vld [vmem:[#allocation9 + $0x90] sm:$0xff]   ;;  %v1402_v48 = vld [vmem:[#allocation9 + $0x58] sm:$0xff]   ;;  %v1406_v52 = vld [vmem:[#allocation9 + $0x60] sm:$0xff]   ;;  %s1516_s24 = scalar_lea.vmem %s1859_s11, 128  ;;  %p1926_p12 = scmp.ne.s32.totalorder %s1922_s14, 0 }
  0x7d   : > { %550 = vmatprep.subr.bf16.mxu0 %v1366_v17  ;;  %591 = vmatprep.subr.bf16.mxu1 %v1368_v18  ;;  %v1403_v49 = vld [vmem:[#allocation9 + $0xd8] sm:$0xff]   ;;  %v1407_v53 = vld [vmem:[#allocation9 + $0xe0] sm:$0xff]   ;;  %v1410_v56 = vld [vmem:[#allocation9 + $0x68] sm:$0xff]   ;;  %p1517_p8 = scmp.ne.s32.totalorder %s1859_s11, %s1516_s24  ;;  %s1612_s21 = smov [#allocation10]  }
  0x7e   : > { %v1404_v50 = vld [vmem:[#allocation9 + $0x18] sm:$0xff]   ;;  %v1408_v54 = vld [vmem:[#allocation9 + $0x20] sm:$0xff]   ;;  %v1411_v57 = vld [vmem:[#allocation9 + $0xe8] sm:$0xff]   ;;  %s1520_s16 = sshll.u32 %s1612_s21, 4  ;;  %s1521_s16 = int_to_ptr.vmem [resolvable:$false] %s1520_s16 }
  0x7f   : > { %v1405_v51 = vld [vmem:[#allocation9 + $0x98] sm:$0xff]   ;;  %v1409_v55 = vld [vmem:[#allocation9 + $0xa0] sm:$0xff]   ;;  %v1412_v58 = vld [vmem:[#allocation9 + $0x28] sm:$0xff]   ;;  %p1518_p1 = pnand %p1517_p8, %p1926_p12  ;;  %s1522_s7 = scalar_lea.vmem %s1521_s16, 256 }
  0x80   : > { %551 = vmatpush1.bf16.msra.mxu0 %v1370_v19  ;;  %592 = vmatpush1.bf16.msra.mxu1 %v1371_v20  ;;  %v1413_v59 = vld [vmem:[#allocation9 + $0xa8] sm:$0xff]   ;;  %v1414_v60 = vld [vmem:[#allocation9 + $0x70] sm:$0xff]   ;;  %v1418_v0 = vld [vmem:[#allocation9 + $0x78] sm:$0xff]   ;;  %p1523_p3 = scmp.lt.s32.totalorder %s1859_s11, %s1521_s16  ;;  %p1524_p5 = scmp.lt.s32.totalorder %s1522_s7, %s1516_s24 }
  0x81   : > { %552 = vmatprep.subr.bf16.mxu0 %v1372_v21  ;;  %593 = vmatprep.subr.bf16.mxu1 %v1374_v22  ;;  %v327_v39 = vld [vmem:[#allocation3] sm:$0xf]  ;;  %v1415_v61 = vld [vmem:[#allocation9 + $0xf0] sm:$0xff]   ;;  %v1419_v1 = vld [vmem:[#allocation9 + $0xf8] sm:$0xff]   ;;  %p1519_p10 = pneg %p1518_p1 }
  0x82   : > { %v1416_v62 = vld [vmem:[#allocation9 + $0x30] sm:$0xff]   ;;  %v1420_v2 = vld [vmem:[#allocation9 + $0x38] sm:$0xff]   ;;  %v360_v8 = vld [vmem:[%s1908_s2] sm:$0xf]  ;;  %p1525_p9 = por %p1524_p5, %p1523_p3 }
  0x83   : > { %v1417_v63 = vld [vmem:[#allocation9 + $0xb0] sm:$0xff]   ;;  %v1421_v3 = vld [vmem:[#allocation9 + $0xb8] sm:$0xff]   ;;  %v365_v11 = vrot.slane %v360_v8, %v364_v6  ;;  %v373_v12 = vrot.slane %v360_v8, %v372_v7  ;;  %v369_v13 = vrot.slane %v360_v8, %v368_v9  ;;  %v377_v14 = vrot.slane %v360_v8, %v376_v10 }
  0x84   : > { %553 = vmatpush1.bf16.msra.mxu0 %v1376_v23  ;;  %594 = vmatpush1.bf16.msra.mxu1 %v1377_v24  ;;  %p1526_p11 = pnand %p1525_p9, %p1519_p10 }
  0x85   : > { %554 = vmatprep.subr.bf16.mxu0 %v1378_v25  ;;  %595 = vmatprep.subr.bf16.mxu1 %v1380_v26 }
  0x88   : > { %555 = vmatpush1.bf16.msra.mxu0 %v1382_v28  ;;  %596 = vmatpush1.bf16.msra.mxu1 %v1383_v30 }
  0x89   : > { %556 = vmatprep.subr.bf16.mxu0 %v1384_v31  ;;  %597 = vmatprep.subr.bf16.mxu1 %v1386_v32 }
  0x8c   : > { %557 = vmatpush1.bf16.msra.mxu0 %v1388_v33  ;;  %598 = vmatpush1.bf16.msra.mxu1 %v1389_v34 }
  0x8d   : > { %1210 = vmatprep.subr.bf16.mxu0 %v1390_v35  ;;  %1232 = vmatprep.subr.bf16.mxu1 %v1391_v36 }
  0x8f   : > { %575 = vmatmul.mubr.bf16.vlgmr.msra.gmra.mrb[0].mxu0 %v327_v39  ;;  %616 = vmatmul.mubr.bf16.vlgmr.msra.gmra.mrb[0].mxu1 %v327_v39 }
  0x90   : > { %1211 = vmatpush3.bf16.msra.mxu0 %v1392_v37  ;;  %1233 = vmatpush3.bf16.msra.mxu1 %v1393_v38 }
  0x91   : > { %1212 = vmatprep.subr.bf16.mxu0 %v1394_v40  ;;  %1234 = vmatprep.subr.bf16.mxu1 %v1395_v41 }
  0x94   : > { %1213 = vmatpush3.bf16.msra.mxu0 %v1396_v42  ;;  %1235 = vmatpush3.bf16.msra.mxu1 %v1397_v43 }
  0x95   : > { %1214 = vmatprep.subr.bf16.mxu0 %v1398_v44  ;;  %1236 = vmatprep.subr.bf16.mxu1 %v1399_v45 }
  0x98   : > { %1215 = vmatpush3.bf16.msra.mxu0 %v1400_v46  ;;  %1237 = vmatpush3.bf16.msra.mxu1 %v1401_v47 }
  0x99   : > { %1216 = vmatprep.subr.bf16.mxu0 %v1402_v48  ;;  %1238 = vmatprep.subr.bf16.mxu1 %v1403_v49 }
  0x9c   : > { %1217 = vmatpush3.bf16.msra.mxu0 %v1404_v50  ;;  %1239 = vmatpush3.bf16.msra.mxu1 %v1405_v51 }
  0x9d   : > { %1218 = vmatprep.subr.bf16.mxu0 %v1406_v52  ;;  %1240 = vmatprep.subr.bf16.mxu1 %v1407_v53 }
  0xa0   : > { %1219 = vmatpush3.bf16.msra.mxu0 %v1408_v54  ;;  %1241 = vmatpush3.bf16.msra.mxu1 %v1409_v55 }
  0xa1   : > { %1220 = vmatprep.subr.bf16.mxu0 %v1410_v56  ;;  %1242 = vmatprep.subr.bf16.mxu1 %v1411_v57 }
  0xa4   : > { %1221 = vmatpush3.bf16.msra.mxu0 %v1412_v58  ;;  %1243 = vmatpush3.bf16.msra.mxu1 %v1413_v59 }
  0xa5   : > { %1222 = vmatprep.subr.bf16.mxu0 %v1414_v60  ;;  %1244 = vmatprep.subr.bf16.mxu1 %v1415_v61  ;;  %v1205_v60 = vld [vmem:[%s1910_s4] ss:$0 sm:$0xff] }
  0xa8   : > { %1223 = vmatpush3.bf16.msra.mxu0 %v1416_v62  ;;  %1245 = vmatpush3.bf16.msra.mxu1 %v1417_v63 }
  0xa9   : > { %1224 = vmatprep.subr.bf16.mxu0 %v1418_v0  ;;  %1246 = vmatprep.subr.bf16.mxu1 %v1419_v1 }
  0xac   : > { %1225 = vmatpush3.bf16.msra.mxu0 %v1420_v2  ;;  %1247 = vmatpush3.bf16.msra.mxu1 %v1421_v3 }
 0x162   : > { %v576_v15 = vpop.f32.mrb[0].mxu0  ;;  %v617_v16 = vpop.f32.mrb[0].mxu1 }
 0x163   : > { %v577_v17 = vadd.f32 %v576_v15, %v365_v11  ;;  %v618_v18 = vadd.f32 %v617_v16, %v373_v12  ;;  %v578_v19 = vpop.f32.mrb[1].mxu0  ;;  %v619_v20 = vpop.f32.mrb[1].mxu1 }
 0x164   : > { %v579_v21 = vadd.f32 %v578_v19, %v369_v13  ;;  %v620_v22 = vadd.f32 %v619_v20, %v377_v14  ;;  %v580_v23 = vpop.f32.mrb[2].mxu0  ;;  %v621_v24 = vpop.f32.mrb[2].mxu1 }
 0x165   : > { %v628_v25 = vmul.f32 0.70710677, %v577_v17  ;;  %v630_v26 = vmul.f32 0.70710677, %v618_v18  ;;  %v581_v29 = vpop.f32.mrb[3].mxu0  ;;  %v622_v30 = vpop.f32.mrb[3].mxu1 }
 0x166   : > { %v629_v27 = vmul.f32 0.70710677, %v579_v21  ;;  %v631_v28 = vmul.f32 0.70710677, %v620_v22  ;;  %v624_v35 = vmul.f32 0.5, %v577_v17  ;;  %v626_v38 = vmul.f32 0.5, %v618_v18 }
 0x167   : > { %1422 = verf.f32 %v628_v25  ;;  %v625_v39 = vmul.f32 0.5, %v579_v21  ;;  %v627_v42 = vmul.f32 0.5, %v620_v22 }
 0x168   : > { %1424 = verf.f32 %v630_v26 }
 0x169   : > { %1426 = verf.f32 %v629_v27 }
 0x16a   : > { %1428 = verf.f32 %v631_v28 }
 0x171   : > { %v1423_v31 = vpop.eup %1422 }
 0x172   : > { %v1425_v32 = vpop.eup %1424  ;;  %v636_v33 = vadd.f32 1.0, %v1423_v31 }
 0x173   : > { %v1427_v34 = vpop.eup %1426  ;;  %v638_v36 = vadd.f32 1.0, %v1425_v32 }
 0x174   : > { %v1429_v37 = vpop.eup %1428  ;;  %v637_v40 = vadd.f32 1.0, %v1427_v34  ;;  %v640_v41 = vmul.f32 %v636_v33, %v624_v35 }
 0x175   : > { %v639_v43 = vadd.f32 1.0, %v1429_v37  ;;  %v642_v44 = vmul.f32 %v638_v36, %v626_v38 }
 0x176   : > { %v641_v45 = vmul.f32 %v637_v40, %v625_v39  ;;  %v645_v48 = vpack.c.bf16 %v640_v41, %v640_v41 }
 0x177   : > { %v643_v46 = vmul.f32 %v639_v43, %v627_v42  ;;  %v647_v50 = vpack.c.bf16 %v642_v44, %v642_v44 }
 0x178   : > { %v646_v47 = vpack.c.bf16 %v641_v45, %v641_v45 }
 0x179   : > { %v648_v49 = vpack.c.bf16 %v643_v46, %v643_v46 }
 0x17a   : > { %937 = vmatprep.mubr.bf16.mxu0 %v646_v47 }
 0x17b   : > { %977 = vmatprep.mubr.bf16.mxu1 %v648_v49  ;;  %938 = vmatmul.mubr.bf16.vlgmr.msra.gmra.mrb[4].mxu0 %v645_v48 }
 0x17c   : > { %978 = vmatmul.mubr.bf16.vlgmr.msra.gmra.mrb[4].mxu1 %v647_v50 }
 0x24e   : > { %v1226_v51 = vpop.f32.mrb[4].mxu0 }
 0x24f   : > { %v1248_v52 = vpop.f32.mrb[4].mxu1  ;;  %v1227_v53 = vpop.f32.mrb[5].mxu0 }
 0x250   : > { %v1228_v54 = vadd.f32 %v1227_v53, %v1226_v51  ;;  %v1249_v55 = vpop.f32.mrb[5].mxu1  ;;  %v1229_v56 = vpop.f32.mrb[6].mxu0 }
 0x251   : > { %v1250_v57 = vadd.f32 %v1249_v55, %v1248_v52  ;;  %v1251_v58 = vpop.f32.mrb[6].mxu1  ;;  %v1230_v59 = vpop.f32.mrb[7].mxu0 }
 0x252   : > { %v1252_v61 = vpop.f32.mrb[7].mxu1 }
 0x253   : > { %v980_v62 = vadd.f32 %v1250_v57, %v1228_v54 }
 0x255   : > { %v998_v63 = vadd.f32 %v1205_v60, %v980_v62 }
 0x257   : > { %999 = vst [vmem:[%s310_s9] sm:$0xff] %v998_v63 }
 0x258   : > { %1529 = shalt.err (!%p1526_p11)
}
 0x259   : > { %s1530_s13 = scalar_lea.hbm %s1857_s8, 128  ;;  %s1534_s30 = scalar_lea.hbm %s1911_s5, 256 }
 0x25a   : > { %p1531_p0 = scmp.ne.s32.totalorder %s1857_s8, %s1530_s13  ;;  %p1535_p6 = scmp.lt.u32.totalorder %s1857_s8, %s1911_s5 }
 0x25b   : > { %p1536_p7 = scmp.lt.u32.totalorder %s1534_s30, %s1530_s13  ;;  %p1538_p8 = scmp.lt.u32.totalorder %s1530_s13, %s1857_s8 }
 0x25c   : > { %p1532_p4 = pnand %p1531_p0, %p1926_p12 }
 0x25d   : > { %p1537_p2 = por %p1536_p7, %p1535_p6 }
 0x25e   : > { %p1533_p13 = pneg %p1532_p4 }
 0x25f   : > { %p1539_p1 = por %p1538_p8, %p1537_p2 }
 0x261   : > { %p1540_p10 = pnand %p1539_p1, %p1533_p13 }
 0x263   : > { %1543 = shalt.err (!%p1540_p10)
}
 0x264   : > { %1264 = dma.vmem_to_hbm [thread:$0]  (%p1926_p12), %s1859_s11, 128, %s1857_s8, %s1001_s10  }
 0x265 PF: > { %s1026_s9 = sand.u32 1, %s1582_s18   ;;  %p1927_p3 = scmp.ne.s32.totalorder %s1919_s29, 0 }
 0x266   : > { %p1928_p5 = scmp.ge.s32.totalorder %s1602_s23, 2  ;;  %s1027_s15 = scalar_lea.sflag [#allocation6], %s1026_s9 }
 0x268   : > { %p1278_p9 = pnand %p1928_p5, %p1927_p3 }
 0x26a   : > { %1577 = dma.done.wait (!%p1278_p9), %s1027_s15, 128  }
 0x26b   : > { %1579 = vsyncadd (!%p1278_p9), %s1027_s15, 4294967168  ;;  %s22_s23 = sadd.s32 1, %s1602_s23   ;;  %s1929_s18 = smov %s1586_s19 }
 0x26c   : > { %p19_p11 = scmp.ge.s32.totalorder %s22_s23, 4   ;;  %s1930_s19 = smov %s1590_s20 }
 0x26d   : > { %s1931_s20 = smov %s1785_s17  ;;  %s1932_s21 = smov %s1598_s22 }
 0x26e   : > { %s1933_s22 = smov %s1935_s12  ;;  %21 = sbr.rel (!%p19_p11) target bundleno = 7 (0x7), region = 106 }
 0x275   :  { %1032 = vsyncpa [#allocation5], 1 }
 0x276   :  { %1034 = vsyncpa [#allocation5 + $0x1], 1 }
 0x277   :  { %1035 = vsyncpa [#allocation8], 1 }
 0x278   :  { %1036 = vsyncpa [#allocation6], 1 }
 0x279   :  { %1038 = vsyncpa [#allocation6 + $0x1], 1 }

</bundles_post_ra>
